<compile_context>
chip_gen: v5e
topology: v5e:2x2
jax: 0.10.0
libtpu: 0.0.40
codegen_flags: <defaults>
</compile_context>

<pallas_src>
import functools

import jax
import jax.numpy as jnp
from jax.experimental import pallas as pl
from jax.experimental.pallas import tpu as pltpu

_SUB = 8                    # sublanes per vreg (f32)
_DEFAULT_TILE_LANES = 8192  # pixels-per-tile = 8 * TILE_LANES = 64K


def _plan_tiles(HW, tile_lanes):
    """Returns (L_total, tile_lanes, num_tiles) for the (8, L_total) pixel view."""
    tile_lanes = max(128, (int(tile_lanes) + 127) // 128 * 128)
    l_min = -(-HW // _SUB)                      # ceil(HW / 8)
    if l_min <= tile_lanes:
        return l_min, l_min, 1                  # single tile (fused path)
    nt = -(-l_min // tile_lanes)
    return nt * tile_lanes, tile_lanes, nt


def _accum_components(prm, x, y, K):
    """prm: (8, 8K+1) coefficient rows (identical across sublanes); x,y: (8,T).

    Returns (sum_k pi_k * f_k, sum_k pi_k * color_k * f_k)."""
    x2 = x * x
    y2 = y * y
    xy = x * y
    gs = jnp.zeros_like(x)
    cs = jnp.zeros_like(x)
    for k in range(K):                          # statically unrolled (K small)
        def col(r, _k=k):
            c = r * K + _k
            return prm[:, c:c + 1]              # (8, 1) lane-broadcast column
        ca, cb, cc, cd, ce, cf = (col(r) for r in range(6))
        pk = col(6)                             # pi
        pck = col(7)                            # pi * color
        expo = (ca * x2 + cb * y2) + (cc * xy + cd * x) + (ce * y + cf)
        f = jnp.exp(expo)                       # EUP
        gs = gs + pk * f
        cs = cs + pck * f
    return gs, cs


def _gmm_fused_kernel(coef_ref, mono_ref, mask_ref, noise_ref, *, K):
    # coef_ref: (1, 8, 8K+1)  mono_ref: (3, 8, L)  outputs: (1, 8, L)
    prm = coef_ref[0]                           # (8, 8K+1)
    x = mono_ref[0]                             # (8, L)
    y = mono_ref[1]
    negm = mono_ref[2]                          # 0 for valid pixels, -3e38 for pad
    gs, cs = _accum_components(prm, x, y, K)
    tm = jnp.max(gs + negm, axis=-1, keepdims=True)      # (8, 1) lane reduce
    gmax = jnp.max(tm, axis=0, keepdims=True)             # (1, 1) sublane reduce
    inv = prm[:, 8 * K:8 * K + 1] / gmax                   # scale / max, tiny exact div
    mask_ref[0] = 1.0 - gs * inv
    noise_ref[0] = cs * inv


def _gmm_pass1_kernel(coef_ref, mono_ref, gsum_ref, csum_ref, mx_ref, rmax_ref, *, K):
    # Streams un-normalized sums; carries a running per-sublane max across the
    # (last, "arbitrary") pixel-tile axis in a tiny VMEM scratch.
    t = pl.program_id(1)
    prm = coef_ref[0]                           # (8, 8K+1)
    x = mono_ref[0]                             # (8, TL)
    y = mono_ref[1]
    negm = mono_ref[2]
    gs, cs = _accum_components(prm, x, y, K)
    gsum_ref[0] = gs
    csum_ref[0] = cs
    tm = jnp.max(gs + negm, axis=-1, keepdims=True)        # (8, 1)

    @pl.when(t == 0)
    def _():
        rmax_ref[...] = tm

    @pl.when(t != 0)
    def _():
        rmax_ref[...] = jnp.maximum(rmax_ref[...], tm)

    mx_ref[0] = rmax_ref[...]                    # resident (1,8,1) block; last write wins


def _normalize_kernel(inv_ref, gsum_ref, csum_ref, mask_ref, noise_ref):
    inv = inv_ref[0]                             # (8, 1)  scale / global max
    g = gsum_ref[0]                              # (8, TL)
    c = csum_ref[0]
    mask_ref[0] = 1.0 - g * inv
    noise_ref[0] = c * inv


def gmm_generator_forward(gmm_params, N, W, H, *, tile_lanes=_DEFAULT_TILE_LANES):
    """gmm_params = (color, mu_x, mu_y, sigma_x, sigma_y, rho, pi, scale), each of
    shape (N,1,1,1,K) except scale of shape (N,1,1,1,1).
    Returns (mask, noise), each (N, 1, H, W) float32."""
    color, mu_x, mu_y, sigma_x, sigma_y, rho, pi, scale = gmm_params
    K = color.shape[-1]

    def flat(a):
        return jnp.asarray(a, jnp.float32).reshape(N, K)

    color = flat(color); mu_x = flat(mu_x); mu_y = flat(mu_y)
    sigma_x = flat(sigma_x); sigma_y = flat(sigma_y)
    rho = flat(rho); pi = flat(pi)
    scl = jnp.asarray(scale, jnp.float32).reshape(N, 1)

    # --- Per-component quadratic coefficients (O(N*K) work, done in XLA). ---
    ix = 1.0 / sigma_x
    iy = 1.0 / sigma_y
    cco = -1.0 / (2.0 * (1.0 - rho * rho))
    ix2 = ix * ix
    iy2 = iy * iy
    rxy = rho * ix * iy
    ca = cco * ix2
    cb = cco * iy2
    cc_ = -2.0 * cco * rxy
    cd = -2.0 * cco * (ix2 * mu_x - rxy * mu_y)
    ce = -2.0 * cco * (iy2 * mu_y - rxy * mu_x)
    cf = cco * (ix2 * mu_x * mu_x + iy2 * mu_y * mu_y - 2.0 * rxy * mu_x * mu_y)
    pck = pi * color

    ncoef = 8 * K + 1
    cols = jnp.concatenate([ca, cb, cc_, cd, ce, cf, pi, pck, scl], axis=-1)  # (N, 8K+1)
    # Replicate across 8 sublane rows so in-kernel broadcasts are lane-only.
    table = jnp.broadcast_to(cols[:, None, :], (N, _SUB, ncoef)).astype(jnp.float32)

    # --- Pixel layout planning & precomputed coordinate planes. ---
    HW = H * W
    L, TL, NT = _plan_tiles(HW, tile_lanes)
    HWp = _SUB * L

    p = jnp.arange(HWp, dtype=jnp.int32)
    valid = p < HW
    pc = jnp.minimum(p, HW - 1)                  # clamp pad pixels (keeps exp finite)
    yi = pc // W
    xi = pc - yi * W
    xden = float(max(W - 1, 1))                  # guard degenerate W==1 / H==1
    yden = float(max(H - 1, 1))
    xcoord = xi.astype(jnp.float32) * (2.0 / xden) - 1.0
    ycoord = yi.astype(jnp.float32) * (2.0 / yden) - 1.0
    negmask = jnp.where(valid, 0.0, -3.0e38).astype(jnp.float32)
    mono = jnp.stack([xcoord, ycoord, negmask], axis=0).reshape(3, _SUB, L)

    # VMEM budget: mono (3 planes x 2 buffers) + 2 outputs x 2 buffers + temps.
    slab = _SUB * TL * 4
    vmem_limit = int(min(40 * 2**20, max(24 * 2**20, 40 * slab)))

    if NT == 1:
        # Fused single-tile path: sums, max and normalization in one pass.
        mask8, noise8 = pl.pallas_call(
            functools.partial(_gmm_fused_kernel, K=K),
            out_shape=[jax.ShapeDtypeStruct((N, _SUB, L), jnp.float32),
                       jax.ShapeDtypeStruct((N, _SUB, L), jnp.float32)],
            grid=(N,),
            in_specs=[pl.BlockSpec((1, _SUB, ncoef), lambda n: (n, 0, 0)),
                      pl.BlockSpec((3, _SUB, L), lambda n: (0, 0, 0))],
            out_specs=[pl.BlockSpec((1, _SUB, L), lambda n: (n, 0, 0)),
                       pl.BlockSpec((1, _SUB, L), lambda n: (n, 0, 0))],
            compiler_params=pltpu.CompilerParams(
                dimension_semantics=("parallel",), vmem_limit_bytes=vmem_limit),
        )(table, mono)
    else:
        # Pass 1: un-normalized sums + per-batch running max (pixel axis tiled).
        gsum, csum, mx = pl.pallas_call(
            functools.partial(_gmm_pass1_kernel, K=K),
            out_shape=[jax.ShapeDtypeStruct((N, _SUB, L), jnp.float32),
                       jax.ShapeDtypeStruct((N, _SUB, L), jnp.float32),
                       jax.ShapeDtypeStruct((N, _SUB, 1), jnp.float32)],
            grid=(N, NT),
            in_specs=[pl.BlockSpec((1, _SUB, ncoef), lambda n, t: (n, 0, 0)),
                      pl.BlockSpec((3, _SUB, TL), lambda n, t: (0, 0, t))],
            out_specs=[pl.BlockSpec((1, _SUB, TL), lambda n, t: (n, 0, t)),
                       pl.BlockSpec((1, _SUB, TL), lambda n, t: (n, 0, t)),
                       pl.BlockSpec((1, _SUB, 1), lambda n, t: (n, 0, 0))],
            scratch_shapes=[pltpu.VMEM((_SUB, 1), jnp.float32)],
            compiler_params=pltpu.CompilerParams(
                dimension_semantics=("parallel", "arbitrary"),
                vmem_limit_bytes=vmem_limit),
        )(table, mono)

        gmax = jnp.max(mx[:, :, 0], axis=1)                       # (N,) tiny XLA op
        inv = scl[:, 0] / gmax                                    # (N,)
        inv_tab = jnp.broadcast_to(inv[:, None, None], (N, _SUB, 1)).astype(jnp.float32)

        # Pass 2: cheap normalize sweep; both grid axes parallel.
        mask8, noise8 = pl.pallas_call(
            _normalize_kernel,
            out_shape=[jax.ShapeDtypeStruct((N, _SUB, L), jnp.float32),
                       jax.ShapeDtypeStruct((N, _SUB, L), jnp.float32)],
            grid=(N, NT),
            in_specs=[pl.BlockSpec((1, _SUB, 1), lambda n, t: (n, 0, 0)),
                      pl.BlockSpec((1, _SUB, TL), lambda n, t: (n, 0, t)),
                      pl.BlockSpec((1, _SUB, TL), lambda n, t: (n, 0, t))],
            out_specs=[pl.BlockSpec((1, _SUB, TL), lambda n, t: (n, 0, t)),
                       pl.BlockSpec((1, _SUB, TL), lambda n, t: (n, 0, t))],
            compiler_params=pltpu.CompilerParams(
                dimension_semantics=("parallel", "parallel"),
                vmem_limit_bytes=vmem_limit),
        )(inv_tab, gsum, csum)

    # Back to the PyTorch module's (N, 1, H, W) convention (drop lane padding).
    mask = mask8.reshape(N, HWp)[:, :HW].reshape(N, 1, H, W)
    noise = noise8.reshape(N, HWp)[:, :HW].reshape(N, 1, H, W)
    return mask, noise


def _reference_forward(color, mu_x, mu_y, sigma_x, sigma_y, rho, pi, scale, N, H, W):
    """Pure-JAX transcription of GMMGenerator.forward (torch broadcasting)."""
    x = (jnp.arange(W) / (W - 1) * 2.0 - 1.0).reshape(1, 1, 1, W, 1)
    y = (jnp.arange(H) / (H - 1) * 2.0 - 1.0).reshape(1, 1, H, 1, 1)
    z_x = (x - mu_x) / sigma_x
    z_y = (y - mu_y) / sigma_y
    f_xy = jnp.exp(-(z_x * z_x - 2.0 * rho * z_x * z_y + z_y * z_y)
                   / (2.0 * (1.0 - rho * rho)))
    gauss_prob = f_xy * pi
    gmm_prob = gauss_prob.sum(axis=-1)
    gmm_prob_max = gmm_prob.reshape(N, -1).max(axis=-1).reshape(N, 1, 1, 1, 1)
    norm_gauss_prob = gauss_prob / gmm_prob_max * scale
    mask = 1.0 - norm_gauss_prob.sum(axis=-1)
    noise = (norm_gauss_prob * color).sum(axis=-1)
    return mask, noise


def _make_params(key, N, K):
    ks = jax.random.split(key, 8)
    shp = (N, 1, 1, 1, K)
    color = jax.random.uniform(ks[0], shp, minval=-1.0, maxval=1.0)
    mu_x = jax.random.uniform(ks[1], shp, minval=-0.8, maxval=0.8)
    mu_y = jax.random.uniform(ks[2], shp, minval=-0.8, maxval=0.8)
    sigma_x = jax.random.uniform(ks[3], shp, minval=0.1, maxval=0.5)
    sigma_y = jax.random.uniform(ks[4], shp, minval=0.1, maxval=0.5)
    rho = jax.random.uniform(ks[5], shp, minval=-0.5, maxval=0.5)
    pi = jax.random.uniform(ks[6], shp, minval=0.1, maxval=1.0)
    scale = jax.random.uniform(ks[7], (N, 1, 1, 1, 1), minval=0.5, maxval=1.0)
    return (color, mu_x, mu_y, sigma_x, sigma_y, rho, pi, scale)


if __name__ == "__main__":
    key = jax.random.PRNGKey(0)

    # Case 1: small image -> fused single-tile path.
    N, K, H, W = 2, 8, 16, 16
    params = _make_params(key, N, K)
    mask, noise = gmm_generator_forward(params, N, W, H)
    jax.block_until_ready((mask, noise))
    ref_mask, ref_noise = _reference_forward(*params, N=N, H=H, W=W)
    assert mask.shape == (N, 1, H, W) and noise.shape == (N, 1, H, W)
    assert jnp.allclose(mask, ref_mask, rtol=2e-4, atol=2e-4)
    assert jnp.allclose(noise, ref_noise, rtol=2e-4, atol=2e-4)

    # Case 2: force the tiled two-pass path (NT > 1, with lane padding).
    N2, K2, H2, W2 = 2, 8, 40, 56
    params2 = _make_params(jax.random.PRNGKey(1), N2, K2)
    mask2, noise2 = gmm_generator_forward(params2, N2, W2, H2, tile_lanes=128)
    jax.block_until_ready((mask2, noise2))
    ref_mask2, ref_noise2 = _reference_forward(*params2, N=N2, H=H2, W=W2)
    assert mask2.shape == (N2, 1, H2, W2) and noise2.shape == (N2, 1, H2, W2)
    assert jnp.allclose(mask2, ref_mask2, rtol=2e-4, atol=2e-4)
    assert jnp.allclose(noise2, ref_noise2, rtol=2e-4, atol=2e-4)

    print("KERNEL_OK")
</pallas_src>

<mosaic_0001>
module attributes {stable_mosaic.version = 11 : i64} {
  func.func @_gmm_fused_kernel(%arg0: i32, %arg1: memref<1x8x65xf32, #tpu.memory_space<vmem>>, %arg2: memref<3x8x32xf32, #tpu.memory_space<vmem>>, %arg3: memref<1x8x32xf32, #tpu.memory_space<vmem>>, %arg4: memref<1x8x32xf32, #tpu.memory_space<vmem>>) attributes {dimension_semantics = [#tpu.dimension_semantics<parallel>], iteration_bounds = array<i64: 2>, scalar_prefetch = 0 : i64, scratch_operands = 0 : i64, tpu.core_type = #tpu.core_type<tc>, window_params = [{transform_indices = @transform_0, window_bounds = array<i64: 1, 8, 65>}, {pipeline_mode = #tpu.pipeline_mode<synchronous>, transform_indices = @transform_1, window_bounds = array<i64: 3, 8, 32>}, {transform_indices = @transform_2, window_bounds = array<i64: 1, 8, 32>}, {transform_indices = @transform_3, window_bounds = array<i64: 1, 8, 32>}]} {
    %c0 = arith.constant 0 : index
    %c0_0 = arith.constant 0 : index
    %c0_1 = arith.constant 0 : index
    %0 = vector.load %arg1[%c0, %c0_0, %c0_1] : memref<1x8x65xf32, #tpu.memory_space<vmem>>, vector<1x8x65xf32>
    %1 = vector.shape_cast %0 : vector<1x8x65xf32> to vector<8x65xf32>
    %c0_2 = arith.constant 0 : index
    %c0_3 = arith.constant 0 : index
    %c0_4 = arith.constant 0 : index
    %2 = vector.load %arg2[%c0_2, %c0_3, %c0_4] : memref<3x8x32xf32, #tpu.memory_space<vmem>>, vector<1x8x32xf32>
    %3 = vector.shape_cast %2 : vector<1x8x32xf32> to vector<8x32xf32>
    %c1 = arith.constant 1 : index
    %c0_5 = arith.constant 0 : index
    %c0_6 = arith.constant 0 : index
    %4 = vector.load %arg2[%c1, %c0_5, %c0_6] : memref<3x8x32xf32, #tpu.memory_space<vmem>>, vector<1x8x32xf32>
    %5 = vector.shape_cast %4 : vector<1x8x32xf32> to vector<8x32xf32>
    %c2 = arith.constant 2 : index
    %c0_7 = arith.constant 0 : index
    %c0_8 = arith.constant 0 : index
    %6 = vector.load %arg2[%c2, %c0_7, %c0_8] : memref<3x8x32xf32, #tpu.memory_space<vmem>>, vector<1x8x32xf32>
    %7 = vector.shape_cast %6 : vector<1x8x32xf32> to vector<8x32xf32>
    %8 = arith.mulf %3, %3 : vector<8x32xf32>
    %9 = arith.mulf %5, %5 : vector<8x32xf32>
    %10 = arith.mulf %3, %5 : vector<8x32xf32>
    %cst = arith.constant 0.000000e+00 : f32
    %11 = vector.broadcast %cst : f32 to vector<8x32xf32>
    %cst_9 = arith.constant 0.000000e+00 : f32
    %12 = vector.broadcast %cst_9 : f32 to vector<8x32xf32>
    %13 = vector.extract_strided_slice %1 {offsets = [0, 0], sizes = [8, 1], strides = [1, 1]} : vector<8x65xf32> to vector<8x1xf32>
    %14 = vector.extract_strided_slice %1 {offsets = [0, 8], sizes = [8, 1], strides = [1, 1]} : vector<8x65xf32> to vector<8x1xf32>
    %15 = vector.extract_strided_slice %1 {offsets = [0, 16], sizes = [8, 1], strides = [1, 1]} : vector<8x65xf32> to vector<8x1xf32>
    %16 = vector.extract_strided_slice %1 {offsets = [0, 24], sizes = [8, 1], strides = [1, 1]} : vector<8x65xf32> to vector<8x1xf32>
    %17 = vector.extract_strided_slice %1 {offsets = [0, 32], sizes = [8, 1], strides = [1, 1]} : vector<8x65xf32> to vector<8x1xf32>
    %18 = vector.extract_strided_slice %1 {offsets = [0, 40], sizes = [8, 1], strides = [1, 1]} : vector<8x65xf32> to vector<8x1xf32>
    %19 = vector.extract_strided_slice %1 {offsets = [0, 48], sizes = [8, 1], strides = [1, 1]} : vector<8x65xf32> to vector<8x1xf32>
    %20 = vector.extract_strided_slice %1 {offsets = [0, 56], sizes = [8, 1], strides = [1, 1]} : vector<8x65xf32> to vector<8x1xf32>
    %21 = vector.broadcast %13 : vector<8x1xf32> to vector<8x32xf32>
    %22 = arith.mulf %21, %8 : vector<8x32xf32>
    %23 = vector.broadcast %14 : vector<8x1xf32> to vector<8x32xf32>
    %24 = arith.mulf %23, %9 : vector<8x32xf32>
    %25 = arith.addf %22, %24 : vector<8x32xf32>
    %26 = vector.broadcast %15 : vector<8x1xf32> to vector<8x32xf32>
    %27 = arith.mulf %26, %10 : vector<8x32xf32>
    %28 = vector.broadcast %16 : vector<8x1xf32> to vector<8x32xf32>
    %29 = arith.mulf %28, %3 : vector<8x32xf32>
    %30 = arith.addf %27, %29 : vector<8x32xf32>
    %31 = arith.addf %25, %30 : vector<8x32xf32>
    %32 = vector.broadcast %17 : vector<8x1xf32> to vector<8x32xf32>
    %33 = arith.mulf %32, %5 : vector<8x32xf32>
    %34 = vector.broadcast %18 : vector<8x1xf32> to vector<8x32xf32>
    %35 = arith.addf %33, %34 : vector<8x32xf32>
    %36 = arith.addf %31, %35 : vector<8x32xf32>
    %37 = math.exp %36 : vector<8x32xf32>
    %38 = vector.broadcast %19 : vector<8x1xf32> to vector<8x32xf32>
    %39 = arith.mulf %38, %37 : vector<8x32xf32>
    %40 = arith.addf %11, %39 : vector<8x32xf32>
    %41 = vector.broadcast %20 : vector<8x1xf32> to vector<8x32xf32>
    %42 = arith.mulf %41, %37 : vector<8x32xf32>
    %43 = arith.addf %12, %42 : vector<8x32xf32>
    %44 = vector.extract_strided_slice %1 {offsets = [0, 1], sizes = [8, 1], strides = [1, 1]} : vector<8x65xf32> to vector<8x1xf32>
    %45 = vector.extract_strided_slice %1 {offsets = [0, 9], sizes = [8, 1], strides = [1, 1]} : vector<8x65xf32> to vector<8x1xf32>
    %46 = vector.extract_strided_slice %1 {offsets = [0, 17], sizes = [8, 1], strides = [1, 1]} : vector<8x65xf32> to vector<8x1xf32>
    %47 = vector.extract_strided_slice %1 {offsets = [0, 25], sizes = [8, 1], strides = [1, 1]} : vector<8x65xf32> to vector<8x1xf32>
    %48 = vector.extract_strided_slice %1 {offsets = [0, 33], sizes = [8, 1], strides = [1, 1]} : vector<8x65xf32> to vector<8x1xf32>
    %49 = vector.extract_strided_slice %1 {offsets = [0, 41], sizes = [8, 1], strides = [1, 1]} : vector<8x65xf32> to vector<8x1xf32>
    %50 = vector.extract_strided_slice %1 {offsets = [0, 49], sizes = [8, 1], strides = [1, 1]} : vector<8x65xf32> to vector<8x1xf32>
    %51 = vector.extract_strided_slice %1 {offsets = [0, 57], sizes = [8, 1], strides = [1, 1]} : vector<8x65xf32> to vector<8x1xf32>
    %52 = vector.broadcast %44 : vector<8x1xf32> to vector<8x32xf32>
    %53 = arith.mulf %52, %8 : vector<8x32xf32>
    %54 = vector.broadcast %45 : vector<8x1xf32> to vector<8x32xf32>
    %55 = arith.mulf %54, %9 : vector<8x32xf32>
    %56 = arith.addf %53, %55 : vector<8x32xf32>
    %57 = vector.broadcast %46 : vector<8x1xf32> to vector<8x32xf32>
    %58 = arith.mulf %57, %10 : vector<8x32xf32>
    %59 = vector.broadcast %47 : vector<8x1xf32> to vector<8x32xf32>
    %60 = arith.mulf %59, %3 : vector<8x32xf32>
    %61 = arith.addf %58, %60 : vector<8x32xf32>
    %62 = arith.addf %56, %61 : vector<8x32xf32>
    %63 = vector.broadcast %48 : vector<8x1xf32> to vector<8x32xf32>
    %64 = arith.mulf %63, %5 : vector<8x32xf32>
    %65 = vector.broadcast %49 : vector<8x1xf32> to vector<8x32xf32>
    %66 = arith.addf %64, %65 : vector<8x32xf32>
    %67 = arith.addf %62, %66 : vector<8x32xf32>
    %68 = math.exp %67 : vector<8x32xf32>
    %69 = vector.broadcast %50 : vector<8x1xf32> to vector<8x32xf32>
    %70 = arith.mulf %69, %68 : vector<8x32xf32>
    %71 = arith.addf %40, %70 : vector<8x32xf32>
    %72 = vector.broadcast %51 : vector<8x1xf32> to vector<8x32xf32>
    %73 = arith.mulf %72, %68 : vector<8x32xf32>
    %74 = arith.addf %43, %73 : vector<8x32xf32>
    %75 = vector.extract_strided_slice %1 {offsets = [0, 2], sizes = [8, 1], strides = [1, 1]} : vector<8x65xf32> to vector<8x1xf32>
    %76 = vector.extract_strided_slice %1 {offsets = [0, 10], sizes = [8, 1], strides = [1, 1]} : vector<8x65xf32> to vector<8x1xf32>
    %77 = vector.extract_strided_slice %1 {offsets = [0, 18], sizes = [8, 1], strides = [1, 1]} : vector<8x65xf32> to vector<8x1xf32>
    %78 = vector.extract_strided_slice %1 {offsets = [0, 26], sizes = [8, 1], strides = [1, 1]} : vector<8x65xf32> to vector<8x1xf32>
    %79 = vector.extract_strided_slice %1 {offsets = [0, 34], sizes = [8, 1], strides = [1, 1]} : vector<8x65xf32> to vector<8x1xf32>
    %80 = vector.extract_strided_slice %1 {offsets = [0, 42], sizes = [8, 1], strides = [1, 1]} : vector<8x65xf32> to vector<8x1xf32>
    %81 = vector.extract_strided_slice %1 {offsets = [0, 50], sizes = [8, 1], strides = [1, 1]} : vector<8x65xf32> to vector<8x1xf32>
    %82 = vector.extract_strided_slice %1 {offsets = [0, 58], sizes = [8, 1], strides = [1, 1]} : vector<8x65xf32> to vector<8x1xf32>
    %83 = vector.broadcast %75 : vector<8x1xf32> to vector<8x32xf32>
    %84 = arith.mulf %83, %8 : vector<8x32xf32>
    %85 = vector.broadcast %76 : vector<8x1xf32> to vector<8x32xf32>
    %86 = arith.mulf %85, %9 : vector<8x32xf32>
    %87 = arith.addf %84, %86 : vector<8x32xf32>
    %88 = vector.broadcast %77 : vector<8x1xf32> to vector<8x32xf32>
    %89 = arith.mulf %88, %10 : vector<8x32xf32>
    %90 = vector.broadcast %78 : vector<8x1xf32> to vector<8x32xf32>
    %91 = arith.mulf %90, %3 : vector<8x32xf32>
    %92 = arith.addf %89, %91 : vector<8x32xf32>
    %93 = arith.addf %87, %92 : vector<8x32xf32>
    %94 = vector.broadcast %79 : vector<8x1xf32> to vector<8x32xf32>
    %95 = arith.mulf %94, %5 : vector<8x32xf32>
    %96 = vector.broadcast %80 : vector<8x1xf32> to vector<8x32xf32>
    %97 = arith.addf %95, %96 : vector<8x32xf32>
    %98 = arith.addf %93, %97 : vector<8x32xf32>
    %99 = math.exp %98 : vector<8x32xf32>
    %100 = vector.broadcast %81 : vector<8x1xf32> to vector<8x32xf32>
    %101 = arith.mulf %100, %99 : vector<8x32xf32>
    %102 = arith.addf %71, %101 : vector<8x32xf32>
    %103 = vector.broadcast %82 : vector<8x1xf32> to vector<8x32xf32>
    %104 = arith.mulf %103, %99 : vector<8x32xf32>
    %105 = arith.addf %74, %104 : vector<8x32xf32>
    %106 = vector.extract_strided_slice %1 {offsets = [0, 3], sizes = [8, 1], strides = [1, 1]} : vector<8x65xf32> to vector<8x1xf32>
    %107 = vector.extract_strided_slice %1 {offsets = [0, 11], sizes = [8, 1], strides = [1, 1]} : vector<8x65xf32> to vector<8x1xf32>
    %108 = vector.extract_strided_slice %1 {offsets = [0, 19], sizes = [8, 1], strides = [1, 1]} : vector<8x65xf32> to vector<8x1xf32>
    %109 = vector.extract_strided_slice %1 {offsets = [0, 27], sizes = [8, 1], strides = [1, 1]} : vector<8x65xf32> to vector<8x1xf32>
    %110 = vector.extract_strided_slice %1 {offsets = [0, 35], sizes = [8, 1], strides = [1, 1]} : vector<8x65xf32> to vector<8x1xf32>
    %111 = vector.extract_strided_slice %1 {offsets = [0, 43], sizes = [8, 1], strides = [1, 1]} : vector<8x65xf32> to vector<8x1xf32>
    %112 = vector.extract_strided_slice %1 {offsets = [0, 51], sizes = [8, 1], strides = [1, 1]} : vector<8x65xf32> to vector<8x1xf32>
    %113 = vector.extract_strided_slice %1 {offsets = [0, 59], sizes = [8, 1], strides = [1, 1]} : vector<8x65xf32> to vector<8x1xf32>
    %114 = vector.broadcast %106 : vector<8x1xf32> to vector<8x32xf32>
    %115 = arith.mulf %114, %8 : vector<8x32xf32>
    %116 = vector.broadcast %107 : vector<8x1xf32> to vector<8x32xf32>
    %117 = arith.mulf %116, %9 : vector<8x32xf32>
    %118 = arith.addf %115, %117 : vector<8x32xf32>
    %119 = vector.broadcast %108 : vector<8x1xf32> to vector<8x32xf32>
    %120 = arith.mulf %119, %10 : vector<8x32xf32>
    %121 = vector.broadcast %109 : vector<8x1xf32> to vector<8x32xf32>
    %122 = arith.mulf %121, %3 : vector<8x32xf32>
    %123 = arith.addf %120, %122 : vector<8x32xf32>
    %124 = arith.addf %118, %123 : vector<8x32xf32>
    %125 = vector.broadcast %110 : vector<8x1xf32> to vector<8x32xf32>
    %126 = arith.mulf %125, %5 : vector<8x32xf32>
    %127 = vector.broadcast %111 : vector<8x1xf32> to vector<8x32xf32>
    %128 = arith.addf %126, %127 : vector<8x32xf32>
    %129 = arith.addf %124, %128 : vector<8x32xf32>
    %130 = math.exp %129 : vector<8x32xf32>
    %131 = vector.broadcast %112 : vector<8x1xf32> to vector<8x32xf32>
    %132 = arith.mulf %131, %130 : vector<8x32xf32>
    %133 = arith.addf %102, %132 : vector<8x32xf32>
    %134 = vector.broadcast %113 : vector<8x1xf32> to vector<8x32xf32>
    %135 = arith.mulf %134, %130 : vector<8x32xf32>
    %136 = arith.addf %105, %135 : vector<8x32xf32>
    %137 = vector.extract_strided_slice %1 {offsets = [0, 4], sizes = [8, 1], strides = [1, 1]} : vector<8x65xf32> to vector<8x1xf32>
    %138 = vector.extract_strided_slice %1 {offsets = [0, 12], sizes = [8, 1], strides = [1, 1]} : vector<8x65xf32> to vector<8x1xf32>
    %139 = vector.extract_strided_slice %1 {offsets = [0, 20], sizes = [8, 1], strides = [1, 1]} : vector<8x65xf32> to vector<8x1xf32>
    %140 = vector.extract_strided_slice %1 {offsets = [0, 28], sizes = [8, 1], strides = [1, 1]} : vector<8x65xf32> to vector<8x1xf32>
    %141 = vector.extract_strided_slice %1 {offsets = [0, 36], sizes = [8, 1], strides = [1, 1]} : vector<8x65xf32> to vector<8x1xf32>
    %142 = vector.extract_strided_slice %1 {offsets = [0, 44], sizes = [8, 1], strides = [1, 1]} : vector<8x65xf32> to vector<8x1xf32>
    %143 = vector.extract_strided_slice %1 {offsets = [0, 52], sizes = [8, 1], strides = [1, 1]} : vector<8x65xf32> to vector<8x1xf32>
    %144 = vector.extract_strided_slice %1 {offsets = [0, 60], sizes = [8, 1], strides = [1, 1]} : vector<8x65xf32> to vector<8x1xf32>
    %145 = vector.broadcast %137 : vector<8x1xf32> to vector<8x32xf32>
    %146 = arith.mulf %145, %8 : vector<8x32xf32>
    %147 = vector.broadcast %138 : vector<8x1xf32> to vector<8x32xf32>
    %148 = arith.mulf %147, %9 : vector<8x32xf32>
    %149 = arith.addf %146, %148 : vector<8x32xf32>
    %150 = vector.broadcast %139 : vector<8x1xf32> to vector<8x32xf32>
    %151 = arith.mulf %150, %10 : vector<8x32xf32>
    %152 = vector.broadcast %140 : vector<8x1xf32> to vector<8x32xf32>
    %153 = arith.mulf %152, %3 : vector<8x32xf32>
    %154 = arith.addf %151, %153 : vector<8x32xf32>
    %155 = arith.addf %149, %154 : vector<8x32xf32>
    %156 = vector.broadcast %141 : vector<8x1xf32> to vector<8x32xf32>
    %157 = arith.mulf %156, %5 : vector<8x32xf32>
    %158 = vector.broadcast %142 : vector<8x1xf32> to vector<8x32xf32>
    %159 = arith.addf %157, %158 : vector<8x32xf32>
    %160 = arith.addf %155, %159 : vector<8x32xf32>
    %161 = math.exp %160 : vector<8x32xf32>
    %162 = vector.broadcast %143 : vector<8x1xf32> to vector<8x32xf32>
    %163 = arith.mulf %162, %161 : vector<8x32xf32>
    %164 = arith.addf %133, %163 : vector<8x32xf32>
    %165 = vector.broadcast %144 : vector<8x1xf32> to vector<8x32xf32>
    %166 = arith.mulf %165, %161 : vector<8x32xf32>
    %167 = arith.addf %136, %166 : vector<8x32xf32>
    %168 = vector.extract_strided_slice %1 {offsets = [0, 5], sizes = [8, 1], strides = [1, 1]} : vector<8x65xf32> to vector<8x1xf32>
    %169 = vector.extract_strided_slice %1 {offsets = [0, 13], sizes = [8, 1], strides = [1, 1]} : vector<8x65xf32> to vector<8x1xf32>
    %170 = vector.extract_strided_slice %1 {offsets = [0, 21], sizes = [8, 1], strides = [1, 1]} : vector<8x65xf32> to vector<8x1xf32>
    %171 = vector.extract_strided_slice %1 {offsets = [0, 29], sizes = [8, 1], strides = [1, 1]} : vector<8x65xf32> to vector<8x1xf32>
    %172 = vector.extract_strided_slice %1 {offsets = [0, 37], sizes = [8, 1], strides = [1, 1]} : vector<8x65xf32> to vector<8x1xf32>
    %173 = vector.extract_strided_slice %1 {offsets = [0, 45], sizes = [8, 1], strides = [1, 1]} : vector<8x65xf32> to vector<8x1xf32>
    %174 = vector.extract_strided_slice %1 {offsets = [0, 53], sizes = [8, 1], strides = [1, 1]} : vector<8x65xf32> to vector<8x1xf32>
    %175 = vector.extract_strided_slice %1 {offsets = [0, 61], sizes = [8, 1], strides = [1, 1]} : vector<8x65xf32> to vector<8x1xf32>
    %176 = vector.broadcast %168 : vector<8x1xf32> to vector<8x32xf32>
    %177 = arith.mulf %176, %8 : vector<8x32xf32>
    %178 = vector.broadcast %169 : vector<8x1xf32> to vector<8x32xf32>
    %179 = arith.mulf %178, %9 : vector<8x32xf32>
    %180 = arith.addf %177, %179 : vector<8x32xf32>
    %181 = vector.broadcast %170 : vector<8x1xf32> to vector<8x32xf32>
    %182 = arith.mulf %181, %10 : vector<8x32xf32>
    %183 = vector.broadcast %171 : vector<8x1xf32> to vector<8x32xf32>
    %184 = arith.mulf %183, %3 : vector<8x32xf32>
    %185 = arith.addf %182, %184 : vector<8x32xf32>
    %186 = arith.addf %180, %185 : vector<8x32xf32>
    %187 = vector.broadcast %172 : vector<8x1xf32> to vector<8x32xf32>
    %188 = arith.mulf %187, %5 : vector<8x32xf32>
    %189 = vector.broadcast %173 : vector<8x1xf32> to vector<8x32xf32>
    %190 = arith.addf %188, %189 : vector<8x32xf32>
    %191 = arith.addf %186, %190 : vector<8x32xf32>
    %192 = math.exp %191 : vector<8x32xf32>
    %193 = vector.broadcast %174 : vector<8x1xf32> to vector<8x32xf32>
    %194 = arith.mulf %193, %192 : vector<8x32xf32>
    %195 = arith.addf %164, %194 : vector<8x32xf32>
    %196 = vector.broadcast %175 : vector<8x1xf32> to vector<8x32xf32>
    %197 = arith.mulf %196, %192 : vector<8x32xf32>
    %198 = arith.addf %167, %197 : vector<8x32xf32>
    %199 = vector.extract_strided_slice %1 {offsets = [0, 6], sizes = [8, 1], strides = [1, 1]} : vector<8x65xf32> to vector<8x1xf32>
    %200 = vector.extract_strided_slice %1 {offsets = [0, 14], sizes = [8, 1], strides = [1, 1]} : vector<8x65xf32> to vector<8x1xf32>
    %201 = vector.extract_strided_slice %1 {offsets = [0, 22], sizes = [8, 1], strides = [1, 1]} : vector<8x65xf32> to vector<8x1xf32>
    %202 = vector.extract_strided_slice %1 {offsets = [0, 30], sizes = [8, 1], strides = [1, 1]} : vector<8x65xf32> to vector<8x1xf32>
    %203 = vector.extract_strided_slice %1 {offsets = [0, 38], sizes = [8, 1], strides = [1, 1]} : vector<8x65xf32> to vector<8x1xf32>
    %204 = vector.extract_strided_slice %1 {offsets = [0, 46], sizes = [8, 1], strides = [1, 1]} : vector<8x65xf32> to vector<8x1xf32>
    %205 = vector.extract_strided_slice %1 {offsets = [0, 54], sizes = [8, 1], strides = [1, 1]} : vector<8x65xf32> to vector<8x1xf32>
    %206 = vector.extract_strided_slice %1 {offsets = [0, 62], sizes = [8, 1], strides = [1, 1]} : vector<8x65xf32> to vector<8x1xf32>
    %207 = vector.broadcast %199 : vector<8x1xf32> to vector<8x32xf32>
    %208 = arith.mulf %207, %8 : vector<8x32xf32>
    %209 = vector.broadcast %200 : vector<8x1xf32> to vector<8x32xf32>
    %210 = arith.mulf %209, %9 : vector<8x32xf32>
    %211 = arith.addf %208, %210 : vector<8x32xf32>
    %212 = vector.broadcast %201 : vector<8x1xf32> to vector<8x32xf32>
    %213 = arith.mulf %212, %10 : vector<8x32xf32>
    %214 = vector.broadcast %202 : vector<8x1xf32> to vector<8x32xf32>
    %215 = arith.mulf %214, %3 : vector<8x32xf32>
    %216 = arith.addf %213, %215 : vector<8x32xf32>
    %217 = arith.addf %211, %216 : vector<8x32xf32>
    %218 = vector.broadcast %203 : vector<8x1xf32> to vector<8x32xf32>
    %219 = arith.mulf %218, %5 : vector<8x32xf32>
    %220 = vector.broadcast %204 : vector<8x1xf32> to vector<8x32xf32>
    %221 = arith.addf %219, %220 : vector<8x32xf32>
    %222 = arith.addf %217, %221 : vector<8x32xf32>
    %223 = math.exp %222 : vector<8x32xf32>
    %224 = vector.broadcast %205 : vector<8x1xf32> to vector<8x32xf32>
    %225 = arith.mulf %224, %223 : vector<8x32xf32>
    %226 = arith.addf %195, %225 : vector<8x32xf32>
    %227 = vector.broadcast %206 : vector<8x1xf32> to vector<8x32xf32>
    %228 = arith.mulf %227, %223 : vector<8x32xf32>
    %229 = arith.addf %198, %228 : vector<8x32xf32>
    %230 = vector.extract_strided_slice %1 {offsets = [0, 7], sizes = [8, 1], strides = [1, 1]} : vector<8x65xf32> to vector<8x1xf32>
    %231 = vector.extract_strided_slice %1 {offsets = [0, 15], sizes = [8, 1], strides = [1, 1]} : vector<8x65xf32> to vector<8x1xf32>
    %232 = vector.extract_strided_slice %1 {offsets = [0, 23], sizes = [8, 1], strides = [1, 1]} : vector<8x65xf32> to vector<8x1xf32>
    %233 = vector.extract_strided_slice %1 {offsets = [0, 31], sizes = [8, 1], strides = [1, 1]} : vector<8x65xf32> to vector<8x1xf32>
    %234 = vector.extract_strided_slice %1 {offsets = [0, 39], sizes = [8, 1], strides = [1, 1]} : vector<8x65xf32> to vector<8x1xf32>
    %235 = vector.extract_strided_slice %1 {offsets = [0, 47], sizes = [8, 1], strides = [1, 1]} : vector<8x65xf32> to vector<8x1xf32>
    %236 = vector.extract_strided_slice %1 {offsets = [0, 55], sizes = [8, 1], strides = [1, 1]} : vector<8x65xf32> to vector<8x1xf32>
    %237 = vector.extract_strided_slice %1 {offsets = [0, 63], sizes = [8, 1], strides = [1, 1]} : vector<8x65xf32> to vector<8x1xf32>
    %238 = vector.broadcast %230 : vector<8x1xf32> to vector<8x32xf32>
    %239 = arith.mulf %238, %8 : vector<8x32xf32>
    %240 = vector.broadcast %231 : vector<8x1xf32> to vector<8x32xf32>
    %241 = arith.mulf %240, %9 : vector<8x32xf32>
    %242 = arith.addf %239, %241 : vector<8x32xf32>
    %243 = vector.broadcast %232 : vector<8x1xf32> to vector<8x32xf32>
    %244 = arith.mulf %243, %10 : vector<8x32xf32>
    %245 = vector.broadcast %233 : vector<8x1xf32> to vector<8x32xf32>
    %246 = arith.mulf %245, %3 : vector<8x32xf32>
    %247 = arith.addf %244, %246 : vector<8x32xf32>
    %248 = arith.addf %242, %247 : vector<8x32xf32>
    %249 = vector.broadcast %234 : vector<8x1xf32> to vector<8x32xf32>
    %250 = arith.mulf %249, %5 : vector<8x32xf32>
    %251 = vector.broadcast %235 : vector<8x1xf32> to vector<8x32xf32>
    %252 = arith.addf %250, %251 : vector<8x32xf32>
    %253 = arith.addf %248, %252 : vector<8x32xf32>
    %254 = math.exp %253 : vector<8x32xf32>
    %255 = vector.broadcast %236 : vector<8x1xf32> to vector<8x32xf32>
    %256 = arith.mulf %255, %254 : vector<8x32xf32>
    %257 = arith.addf %226, %256 : vector<8x32xf32>
    %258 = vector.broadcast %237 : vector<8x1xf32> to vector<8x32xf32>
    %259 = arith.mulf %258, %254 : vector<8x32xf32>
    %260 = arith.addf %229, %259 : vector<8x32xf32>
    %261 = arith.addf %257, %7 : vector<8x32xf32>
    %cst_10 = arith.constant dense<0xFF800000> : vector<8xf32>
    %262 = vector.multi_reduction <maximumf>, %261, %cst_10 [1] : vector<8x32xf32> to vector<8xf32>
    %263 = vector.shape_cast %262 : vector<8xf32> to vector<8x1xf32>
    %cst_11 = arith.constant dense<0xFF800000> : vector<1xf32>
    %264 = vector.multi_reduction <maximumf>, %263, %cst_11 [0] : vector<8x1xf32> to vector<1xf32>
    %265 = vector.shape_cast %264 : vector<1xf32> to vector<1x1xf32>
    %266 = vector.extract_strided_slice %1 {offsets = [0, 64], sizes = [8, 1], strides = [1, 1]} : vector<8x65xf32> to vector<8x1xf32>
    %267 = vector.broadcast %265 : vector<1x1xf32> to vector<8x1xf32>
    %268 = arith.divf %266, %267 : vector<8x1xf32>
    %269 = vector.broadcast %268 : vector<8x1xf32> to vector<8x32xf32>
    %270 = arith.mulf %257, %269 : vector<8x32xf32>
    %cst_12 = arith.constant 1.000000e+00 : f32
    %271 = vector.broadcast %cst_12 : f32 to vector<8x32xf32>
    %272 = arith.subf %271, %270 : vector<8x32xf32>
    %c0_13 = arith.constant 0 : index
    %c0_14 = arith.constant 0 : index
    %c0_15 = arith.constant 0 : index
    %273 = vector.load %arg3[%c0_13, %c0_14, %c0_15] : memref<1x8x32xf32, #tpu.memory_space<vmem>>, vector<1x8x32xf32>
    %274 = vector.shape_cast %273 : vector<1x8x32xf32> to vector<8x32xf32>
    %275 = vector.shape_cast %272 : vector<8x32xf32> to vector<1x8x32xf32>
    tpu.vector_store %arg3[%c0_13, %c0_14, %c0_15], %275 {strides = array<i32>} : memref<1x8x32xf32, #tpu.memory_space<vmem>>, vector<1x8x32xf32>,
    %276 = vector.broadcast %268 : vector<8x1xf32> to vector<8x32xf32>
    %277 = arith.mulf %260, %276 : vector<8x32xf32>
    %c0_16 = arith.constant 0 : index
    %c0_17 = arith.constant 0 : index
    %c0_18 = arith.constant 0 : index
    %278 = vector.load %arg4[%c0_16, %c0_17, %c0_18] : memref<1x8x32xf32, #tpu.memory_space<vmem>>, vector<1x8x32xf32>
    %279 = vector.shape_cast %278 : vector<1x8x32xf32> to vector<8x32xf32>
    %280 = vector.shape_cast %277 : vector<8x32xf32> to vector<1x8x32xf32>
    tpu.vector_store %arg4[%c0_16, %c0_17, %c0_18], %280 {strides = array<i32>} : memref<1x8x32xf32, #tpu.memory_space<vmem>>, vector<1x8x32xf32>,
    return
  }
  func.func @transform_0(%arg0: i32) -> (i32, i32, i32) {
    %c0_i32 = arith.constant 0 : i32
    %c0_i32_0 = arith.constant 0 : i32
    %c0_i32_1 = arith.constant 0 : i32
    return %arg0, %c0_i32, %c0_i32_0 : i32, i32, i32
  }
  func.func @transform_1(%arg0: i32) -> (i32, i32, i32) {
    %c0_i32 = arith.constant 0 : i32
    %c0_i32_0 = arith.constant 0 : i32
    %c0_i32_1 = arith.constant 0 : i32
    %c0_i32_2 = arith.constant 0 : i32
    return %c0_i32, %c0_i32_0, %c0_i32_1 : i32, i32, i32
  }
  func.func @transform_2(%arg0: i32) -> (i32, i32, i32) {
    %c0_i32 = arith.constant 0 : i32
    %c0_i32_0 = arith.constant 0 : i32
    %c0_i32_1 = arith.constant 0 : i32
    return %arg0, %c0_i32, %c0_i32_0 : i32, i32, i32
  }
  func.func @transform_3(%arg0: i32) -> (i32, i32, i32) {
    %c0_i32 = arith.constant 0 : i32
    %c0_i32_0 = arith.constant 0 : i32
    %c0_i32_1 = arith.constant 0 : i32
    return %arg0, %c0_i32, %c0_i32_0 : i32, i32, i32
  }
}

</mosaic_0001>

<bundles_post_ra>
// kernel: tpu_custom_call.1
= control target key start
LH: loop header
LB: loop body
LE: loop exit
PB: predicated region body
PF: predicated region fallthrough
CT: control target
= control target key end

     0   :  { %9 = vsyncpa [#allocation3], 0  ;;  %s1577_s0 = inlined_call_operand.hbm [shape: f32[2,8,65], index: 0, kind: input, shape index: {}]   ;;  %s1578_s1 = inlined_call_operand.hbm [shape: f32[3,8,32], index: 1, kind: input, shape index: {}]   ;;  %s1579_s2 = inlined_call_operand.hbm [shape: f32[2,8,32], index: 2, kind: output, shape index: {0}]   ;;  %s1580_s3 = inlined_call_operand.hbm [shape: f32[2,8,32], index: 3, kind: output, shape index: {1}]  }
   0x1   :  { %11 = vsyncpa [#allocation3 + $0x1], 0 }
   0x2   :  { %12 = vsyncpa [#allocation6], 0 }
   0x3   :  { %13 = vsyncpa [#allocation4], 0 }
   0x4   :  { %15 = vsyncpa [#allocation4 + $0x1], 0 }
   0x5   :  { %16 = vsyncpa [#allocation9], 0 }
   0x6   :  { %18 = vsyncpa [#allocation9 + $0x1], 0  ;;  %s1275_s12 = smov 0   ;;  %s1277_s13 = smov 0  }
   0x7   :  { %s1279_s14 = smov 0   ;;  %s1281_s15 = smov 0  }
   0x8 LB: > { %s139_s18 = sshll.u32 %s1578_s1, 4  ;;  %s1299_s19 = sadd.s32 4294967295, %s1185_s15   ;;  %s1185_s15 = sphi %s1281_s15, %s1590_s15   ;;  %s1181_s14 = sphi %s1279_s14, %s1589_s14   ;;  %s1177_s13 = sphi %s1277_s13, %s1588_s13   ;;  %s1173_s12 = sphi %s1275_s12, %s1587_s12   ;;  %s140_s18 = int_to_ptr.hbm [resolvable:$true] %s139_s18 }
   0x9   : > { %p795_p0 = scmp.ge.s32.totalorder %s1185_s15, 1  ;;  %p45_p1 = scmp.eq.s32.totalorder %s1299_s19, 0 }
   0xa   : > { %p128_p2 = scmp.lt.s32.totalorder %s1185_s15, 3  ;;  %s1187_s21 = smov [#allocation5]  }
   0xb   : > { %s141_s22 = sshll.u32 %s1187_s21, 4  ;;  %s1188_s23 = smov 128   ;;  %s142_s22 = int_to_ptr.vmem [resolvable:$true] %s141_s22 }
   0xc   : > { %p1304_p3 = pnand %p795_p0, %p128_p2  ;;  %s1189_s24 = smov 8  }
   0xd   : > { %s794_s25 = sadd.s32 4294967294, %s1185_s15   ;;  %s1315_s26 = sadd.s32 1, %s1185_s15  }
   0xe   : > { %p821_p4 = pneg %p1304_p3  ;;  %s31_s27 = sadd.s32 1, %s1181_s14 }
   0xf   : > { %s28_s28 = ssub.s32 %s1185_s15, %s1315_s26  ;;  %p38_p7 = scmp.ne.s32.totalorder %s1181_s14, %s1177_s13 }
  0x10   : > { %p822_p6 = pnand %p821_p4, %p45_p1  ;;  %p29_p8 = scmp.eq.s32.totalorder %s28_s28, 0 }
  0x11   : > { %p39_p9 = scmp.eq.s32.totalorder %s1185_s15, 0  ;;  %p44_p10 = scmp.ne.s32.totalorder %s1177_s13, %s1173_s12 }
  0x12   : > { %824 = dma.hbm_to_vmem [thread:$0]  (!%p822_p6), %s140_s18, 384, %s142_s22, [#allocation6], %s1188_s23, %s1188_s23, %s1189_s24  }
  0x13   : > { %p89_p11 = scmp.eq.s32.totalorder %s1299_s19, 1  ;;  %p1331_p12 = por %p45_p1, %p44_p10 }
  0x14   : > { %s1327_s29 = scalar_select %p29_p8, %s1181_s14, %s31_s27  }
  0x15   : > { %p1335_p13 = por %p89_p11, %p38_p7  ;;  %p95_p0 = scmp.eq.s32.totalorder %s794_s25, 1 }
  0x16   : > { %p40_p2 = por %p39_p9, %p38_p7  ;;  %s155_s5 = sand.u32 1, %s1181_s14  }
  0x17   : > { %p1340_p4 = por %p95_p0, %p44_p10  ;;  %p837_p6 = scmp.lt.s32.totalorder %s1185_s15, 2 }
  0x18   : > { %s798_s7 = sshll.u32 %s155_s5, 3  ;;  %s799_s8 = sshll.u32 %s1185_s15, 3 }
  0x19   : > { %s163_s11 = scalar_lea.hbm %s1577_s0, %s799_s8  ;;  %s159_s17 = scalar_lea.vmem [#allocation2], %s798_s7 }
  0x1a   : > { %s165_s16 = sshll.u32 %s163_s11, 4  ;;  %s167_s18 = sshll.u32 %s159_s17, 4  ;;  %s166_s16 = int_to_ptr.hbm [resolvable:$true] %s165_s16  ;;  %s168_s18 = int_to_ptr.vmem [resolvable:$true] %s167_s18 }
  0x1b   : > { %p1349_p8 = pnand %p837_p6, %p40_p2  ;;  %s156_s22 = scalar_lea.sflag [#allocation3], %s155_s5 }
  0x1c   : > { %s1053_s23 = sshra.s32 %s166_s16, 4  ;;  %s1060_s28 = scalar_lea.hbm %s1577_s0, 16  ;;  %s1054_s23 = int_to_ptr.hbm [resolvable:$true] %s1053_s23 }
  0x1d   : > { %s1055_s24 = scalar_lea.hbm %s1054_s23, 8  ;;  %p1057_p9 = pneg %p1349_p8 }
  0x1e   : > { %p1056_p7 = scmp.ne.s32.totalorder %s1054_s23, %s1055_s24  ;;  %p1061_p0 = scmp.lt.s32.totalorder %s1054_s23, %s1577_s0 }
  0x1f   : > { %p1062_p2 = scmp.lt.s32.totalorder %s1060_s28, %s1055_s24 }
  0x20   : > { %p1058_p10 = pnand %p1057_p9, %p1056_p7 }
  0x21   : > { %p1063_p6 = por %p1062_p2, %p1061_p0 }
  0x22   : > { %p1059_p11 = pneg %p1058_p10 }
  0x24   : > { %p1064_p5 = pnand %p1063_p6, %p1059_p11 }
  0x26   : > { %1067 = shalt.err (!%p1064_p5)
}
  0x27   : > { %828 = dma.hbm_to_vmem [thread:$0]  (!%p1349_p8), %s166_s16, 128, %s168_s18, %s156_s22  }
  0x28   : > { %176 = sbr.rel (%p1304_p3) target bundleno = 663 (0x297), region = 28  ;;  %s1366_s5 = sand.u32 (!%p1304_p3), 1, %s1177_s13  }
  0x29   : > { %s1369_s9 = sshll.u32 (!%p1304_p3), %s1366_s5, 3  ;;  %s179_s10 = scalar_lea.sflag (!%p1304_p3), [#allocation3], %s1366_s5 }
  0x2a   : > { %s182_s11 = scalar_lea.vmem (!%p1304_p3), [#allocation2], %s1369_s9 }
  0x2d   : > { %1156 = dma.done.wait (%p1331_p12), %s179_s10, 128  }
  0x2e   : > { %1158 = vsyncadd (%p1331_p12), %s179_s10, 4294967168 }
  0x2f   : > { %1160 = dma.done.wait (%p45_p1), [#allocation6], 384  }
  0x30   : > { %1162 = vsyncadd (%p45_p1), [#allocation6], 4294966912  ;;  %v1190_v0 = vmov 32   ;;  %v1191_v1 = vmov 16   ;;  %v1192_v2 = vmov 0   ;;  %v1381_v3 = vld [vmem:[%s182_s11] sm:$0xff] }
  0x31   : > { %944 = vset.pattern.permute.xlu2 %v1190_v0  ;;  %942 = vset.pattern.permute.xlu1 %v1191_v1  ;;  %v1193_v4 = vmov 40   ;;  %v1194_v5 = vmov 24   ;;  %v1195_v6 = vmov 8   ;;  %v1196_v7 = vmov 56   ;;  %v1415_v34 = vld [vmem:[#allocation5 + $0x8] sm:$0xff]  ;;  %v1425_v48 = vld [vmem:[#allocation5] sm:$0xff] }
  0x32   : > { %940 = vset.pattern.permute.xlu0 %v1192_v2  ;;  %250 = vperm.xlu2 %944, %v1381_v3   ;;  %v1197_v8 = vmov 48   ;;  %v1198_v9 = vmov 1   ;;  %v1199_v10 = vmov 17   ;;  %v1200_v11 = vmov 9   ;;  %s807_s20 = sshll.u32 %s1299_s19, 3  ;;  %s215_s23 = scalar_lea.vmem [#allocation8], %s1369_s9 }
  0x33   : > { %238 = vperm.xlu1 %942, %v1381_v3   ;;  %227 = vperm.xlu0 %940, %v1381_v3   ;;  %v1201_v12 = vmov 41   ;;  %v1202_v13 = vmov 33   ;;  %v1203_v14 = vmov 25   ;;  %v1204_v15 = vmov 18   ;;  %s676_s17 = scalar_lea.hbm %s1580_s3, %s807_s20  ;;  %s662_s22 = scalar_lea.hbm %s1579_s2, %s807_s20 }
  0x34   : > { %v1205_v16 = vmov 57   ;;  %v1206_v17 = vmov 49   ;;  %v1207_v18 = vmov 58   ;;  %v1208_v19 = vmov 10   ;;  %s1522_s24 = sshll.u32 %s215_s23, 4  ;;  %s680_s25 = sshll.u32 %s676_s17, 4  ;;  %s679_s24 = int_to_ptr.vmem [resolvable:$true] %s1522_s24  ;;  %s681_s25 = int_to_ptr.hbm [resolvable:$true] %s680_s25 }
  0x35   : > { %v1209_v20 = vmov 2   ;;  %v1210_v21 = vmov 35   ;;  %v1211_v22 = vmov 34   ;;  %v1212_v23 = vmov 26   ;;  %s208_s27 = scalar_lea.vmem [#allocation7], %s1369_s9  ;;  %s666_s19 = sshll.u32 %s662_s22, 4  ;;  %s1529_s19 = int_to_ptr.hbm [resolvable:$true] %s666_s19 }
  0x36   : > { %v1213_v24 = vmov 12   ;;  %v1214_v25 = vmov 50   ;;  %v1215_v26 = vmov 42   ;;  %v1216_v27 = vmov 11   ;;  %s1525_s28 = sshll.u32 %s208_s27, 4  ;;  %s652_s7 = scalar_lea.sflag [#allocation9], %s1366_s5  ;;  %s665_s28 = int_to_ptr.vmem [resolvable:$true] %s1525_s28 }
  0x37   : > { %v1217_v28 = vmov 3   ;;  %v1218_v29 = vmov 52   ;;  %v1219_v30 = vmov 27   ;;  %v1220_v31 = vmov 19   ;;  %s1097_s8 = sshra.s32 %s681_s25, 4  ;;  %s1103_s20 = scalar_lea.hbm %s1580_s3, 16  ;;  %s1098_s8 = int_to_ptr.hbm [resolvable:$true] %s1097_s8 }
  0x38   : > { %v1221_v33 = vmov 37   ;;  %v1222_v36 = vmov 51   ;;  %v1223_v37 = vmov 43   ;;  %v1224_v40 = vmov 45   ;;  %s1099_s9 = scalar_lea.hbm %s1098_s8, 8  ;;  %p1104_p12 = scmp.lt.s32.totalorder %s1098_s8, %s1580_s3 }
  0x39   : > { %v1225_v41 = vmov 4   ;;  %v1226_v42 = vmov 59   ;;  %v1227_v43 = vmov 31   ;;  %v1228_v46 = vmov 28   ;;  %p1100_p1 = scmp.ne.s32.totalorder %s1098_s8, %s1099_s9  ;;  %p1105_p8 = scmp.lt.s32.totalorder %s1103_s20, %s1099_s9 }
  0x3a   : > { %945 = vset.pattern.permute.xlu2 %v1193_v4  ;;  %v1229_v47 = vmov 20   ;;  %v1430_v50 = vmul.f32 %v1425_v48, %v1425_v48  ;;  %v1230_v51 = vmov 54   ;;  %v1434_v52 = vmul.f32 %v1415_v34, %v1425_v48 }
  0x3b   : > { %943 = vset.pattern.permute.xlu1 %v1194_v5  ;;  %941 = vset.pattern.permute.xlu0 %v1195_v6  ;;  %v1438_v53 = vmul.f32 %v1415_v34, %v1415_v34  ;;  %v1231_v60 = vmov 44   ;;  %v1232_v61 = vmov 36   ;;  %v1233_v2 = vmov 61   ;;  %p1101_p3 = pnand %p1100_p1, %p1335_p13  ;;  %p1106_p7 = por %p1105_p8, %p1104_p12 }
  0x3c   : > { %255 = vperm.xlu2 %945, %v1381_v3   ;;  %243 = vperm.xlu1 %943, %v1381_v3   ;;  %vm611_vm0 = vcmask 261120  }
  0x3d   : > { %232 = vperm.xlu0 %941, %v1381_v3   ;;  %p1102_p5 = pneg %p1101_p3 }
  0x3f   : > { %p1107_p9 = pnand %p1106_p7, %p1102_p5 }
  0x44   : > { %947 = vset.pattern.permute.xlu2 %v1196_v7  ;;  %946 = vset.pattern.permute.xlu1 %v1197_v8  ;;  %v1234_v7 = vmov 13   ;;  %v1235_v8 = vmov 5  }
  0x45   : > { %269 = vperm.xlu2 %947, %v1381_v3   ;;  %263 = vperm.xlu1 %946, %v1381_v3  }
  0x46   : > { %948 = vset.pattern.permute.xlu0 %v1198_v9 }
  0x47   : > { %275 = vperm.xlu0 %948, %v1381_v3  }
  0x4d   : > { %950 = vset.pattern.permute.xlu2 %v1199_v10  ;;  %949 = vset.pattern.permute.xlu1 %v1200_v11 }
  0x4e   : > { %286 = vperm.xlu2 %950, %v1381_v3   ;;  %280 = vperm.xlu1 %949, %v1381_v3  }
  0x4f   : > { %953 = vset.pattern.permute.xlu0 %v1201_v12 }
  0x50   : > { %303 = vperm.xlu0 %953, %v1381_v3  }
  0x56   : > { %952 = vset.pattern.permute.xlu2 %v1202_v13  ;;  %951 = vset.pattern.permute.xlu1 %v1203_v14 }
  0x57   : > { %298 = vperm.xlu2 %952, %v1381_v3   ;;  %291 = vperm.xlu1 %951, %v1381_v3  }
  0x58   : > { %958 = vset.pattern.permute.xlu0 %v1204_v15  ;;  %v1236_v15 = vmov 29  }
  0x59   : > { %334 = vperm.xlu0 %958, %v1381_v3  }
  0x5f   : > { %955 = vset.pattern.permute.xlu2 %v1205_v16  ;;  %954 = vset.pattern.permute.xlu1 %v1206_v17  ;;  %v1237_v16 = vmov 21  }
  0x60   : > { %317 = vperm.xlu2 %955, %v1381_v3   ;;  %311 = vperm.xlu1 %954, %v1381_v3  }
  0x61   : > { %963 = vset.pattern.permute.xlu0 %v1207_v18 }
  0x62   : > { %365 = vperm.xlu0 %963, %v1381_v3  }
  0x68   : > { %957 = vset.pattern.permute.xlu2 %v1208_v19  ;;  %956 = vset.pattern.permute.xlu1 %v1209_v20 }
  0x69   : > { %328 = vperm.xlu2 %957, %v1381_v3   ;;  %323 = vperm.xlu1 %956, %v1381_v3  }
  0x6a   : > { %968 = vset.pattern.permute.xlu0 %v1210_v21 }
  0x6b   : > { %394 = vperm.xlu0 %968, %v1381_v3  }
  0x71   : > { %960 = vset.pattern.permute.xlu2 %v1211_v22  ;;  %959 = vset.pattern.permute.xlu1 %v1212_v23 }
  0x72   : > { %346 = vperm.xlu2 %960, %v1381_v3   ;;  %339 = vperm.xlu1 %959, %v1381_v3  }
  0x73   : > { %973 = vset.pattern.permute.xlu0 %v1213_v24 }
  0x74   : > { %424 = vperm.xlu0 %973, %v1381_v3  }
  0x7a   : > { %962 = vset.pattern.permute.xlu2 %v1214_v25  ;;  %961 = vset.pattern.permute.xlu1 %v1215_v26  ;;  %v1238_v25 = vmov 14   ;;  %v1239_v26 = vmov 6  }
  0x7b   : > { %359 = vperm.xlu2 %962, %v1381_v3   ;;  %351 = vperm.xlu1 %961, %v1381_v3  }
  0x7c   : > { %978 = vset.pattern.permute.xlu0 %v1218_v29 }
  0x7d   : > { %455 = vperm.xlu0 %978, %v1381_v3  }
  0x83   : > { %965 = vset.pattern.permute.xlu2 %v1216_v27  ;;  %964 = vset.pattern.permute.xlu1 %v1217_v28 }
  0x84   : > { %376 = vperm.xlu2 %965, %v1381_v3   ;;  %371 = vperm.xlu1 %964, %v1381_v3  }
  0x85   : > { %983 = vset.pattern.permute.xlu0 %v1221_v33 }
  0x86   : > { %490 = vperm.xlu0 %983, %v1381_v3  }
  0x8c   : > { %967 = vset.pattern.permute.xlu2 %v1219_v30  ;;  %966 = vset.pattern.permute.xlu1 %v1220_v31  ;;  %v251_v32 = vpop.permute.xlu2 %250 }
  0x8d   : > { %387 = vperm.xlu2 %967, %v1381_v3   ;;  %382 = vperm.xlu1 %966, %v1381_v3   ;;  %v253_v35 = vmul.f32 %v251_v32, %v1415_v34 }
  0x8e   : > { %988 = vset.pattern.permute.xlu0 %v1224_v40 }
  0x8f   : > { %495 = vperm.xlu0 %988, %v1381_v3  }
  0x95   : > { %970 = vset.pattern.permute.xlu2 %v1222_v36  ;;  %969 = vset.pattern.permute.xlu1 %v1223_v37  ;;  %v1240_v36 = vmov 30   ;;  %v1241_v37 = vmov 22  }
  0x96   : > { %407 = vperm.xlu2 %970, %v1381_v3   ;;  %v256_v38 = vpop.permute.xlu2 %255  ;;  %399 = vperm.xlu1 %969, %v1381_v3  }
  0x97   : > { %v258_v39 = vadd.f32 %v256_v38, %v253_v35  ;;  %993 = vset.pattern.permute.xlu0 %v1227_v43 }
  0x98   : > { %579 = vperm.xlu0 %993, %v1381_v3  }
  0x9e   : > { %972 = vset.pattern.permute.xlu2 %v1225_v41  ;;  %971 = vset.pattern.permute.xlu1 %v1226_v42 }
  0x9f   : > { %419 = vperm.xlu2 %972, %v1381_v3   ;;  %413 = vperm.xlu1 %971, %v1381_v3   ;;  %v270_v49 = vpop.permute.xlu2 %269 }
  0xa0   : > { %998 = vset.pattern.permute.xlu0 %v1230_v51 }
  0xa1   : > { %551 = vperm.xlu0 %998, %v1381_v3  }
  0xa5   : > { %v239_v44 = vpop.permute.xlu1 %238  ;;  %v228_v45 = vpop.permute.xlu0 %227 }
  0xa6   : > { %v230_v54 = vmul.f32 %v228_v45, %v1430_v50  ;;  %v241_v57 = vmul.f32 %v239_v44, %v1434_v52  ;;  %v1242_v45 = vmov 7  }
  0xa7   : > { %975 = vset.pattern.permute.xlu2 %v1228_v46  ;;  %974 = vset.pattern.permute.xlu1 %v1229_v47  ;;  %v1243_v47 = vmov 38  }
  0xa8   : > { %435 = vperm.xlu2 %975, %v1381_v3   ;;  %430 = vperm.xlu1 %974, %v1381_v3   ;;  %v287_v0 = vpop.permute.xlu2 %286 }
  0xa9   : > { %1001 = vset.pattern.permute.xlu0 %v1233_v2  ;;  %v289_v23 = vmul.f32 %v287_v0, %v1434_v52 }
  0xaa   : > { %509 = vperm.xlu0 %1001, %v1381_v3  }
  0xae   : > { %v244_v55 = vpop.permute.xlu1 %243 }
  0xaf   : > { %v233_v56 = vpop.permute.xlu0 %232  ;;  %v246_v58 = vmul.f32 %v244_v55, %v1425_v48 }
  0xb0   : > { %v235_v59 = vmul.f32 %v233_v56, %v1438_v53  ;;  %977 = vset.pattern.permute.xlu2 %v1231_v60  ;;  %976 = vset.pattern.permute.xlu1 %v1232_v61  ;;  %v1245_v60 = vmov 15  }
  0xb1   : > { %447 = vperm.xlu2 %977, %v1381_v3   ;;  %v247_v62 = vadd.f32 %v246_v58, %v241_v57  ;;  %442 = vperm.xlu1 %976, %v1381_v3   ;;  %v299_v9 = vpop.permute.xlu2 %298 }
  0xb2   : > { %v236_v63 = vadd.f32 %v235_v59, %v230_v54  ;;  %v301_v20 = vmul.f32 %v299_v9, %v1415_v34  ;;  %v1244_v59 = vmov 23  }
  0xb4   : > { %v248_v1 = vadd.f32 %v247_v62, %v236_v63 }
  0xb6   : > { %v259_v4 = vadd.f32 %v258_v39, %v248_v1 }
  0xb7   : > { %v264_v6 = vpop.permute.xlu1 %263 }
  0xb8   : > { %v260_v5 = vmul.f32 1.442695, %v259_v4  ;;  %v1246_v4 = vmov 39  }
  0xb9   : > { %980 = vset.pattern.permute.xlu2 %v1234_v7  ;;  %979 = vset.pattern.permute.xlu1 %v1235_v8  ;;  %v276_v14 = vpop.permute.xlu0 %275 }
  0xba   : > { %1005 = vpow2.f32 %v260_v5  ;;  %472 = vperm.xlu2 %980, %v1381_v3   ;;  %467 = vperm.xlu1 %979, %v1381_v3   ;;  %v318_v17 = vpop.permute.xlu2 %317  ;;  %v278_v19 = vmul.f32 %v276_v14, %v1430_v50  ;;  %v1247_v5 = vmov 46  }
  0xc0   : > { %v1006_v10 = vpop.eup %1005  ;;  %v281_v13 = vpop.permute.xlu1 %280 }
  0xc1   : > { %v272_v11 = vmul.f32 %v1006_v10, %v270_v49  ;;  %v266_v12 = vmul.f32 %v1006_v10, %v264_v6  ;;  %v283_v18 = vmul.f32 %v281_v13, %v1438_v53  ;;  %v1249_v13 = vmov 47  }
  0xc2   : > { %982 = vset.pattern.permute.xlu2 %v1236_v15  ;;  %981 = vset.pattern.permute.xlu1 %v1237_v16  ;;  %v304_v22 = vpop.permute.xlu0 %303 }
  0xc3   : > { %483 = vperm.xlu2 %982, %v1381_v3   ;;  %478 = vperm.xlu1 %981, %v1381_v3   ;;  %v284_v27 = vadd.f32 %v283_v18, %v278_v19  ;;  %v306_v29 = vadd.f32 %v304_v22, %v301_v20  ;;  %v329_v32 = vpop.permute.xlu2 %328 }
  0xc4   : > { %v331_v39 = vmul.f32 %v329_v32, %v1438_v53  ;;  %v1251_v32 = vmov 60  }
  0xc9   : > { %v292_v21 = vpop.permute.xlu1 %291 }
  0xca   : > { %v294_v24 = vmul.f32 %v292_v21, %v1425_v48 }
  0xcb   : > { %985 = vset.pattern.permute.xlu2 %v1238_v25  ;;  %984 = vset.pattern.permute.xlu1 %v1239_v26  ;;  %v335_v54 = vpop.permute.xlu0 %334 }
  0xcc   : > { %520 = vperm.xlu2 %985, %v1381_v3   ;;  %v295_v28 = vadd.f32 %v294_v24, %v289_v23  ;;  %515 = vperm.xlu1 %984, %v1381_v3   ;;  %v347_v40 = vpop.permute.xlu2 %346  ;;  %v337_v55 = vmul.f32 %v335_v54, %v1434_v52  ;;  %v1250_v24 = vmov 55  }
  0xcd   : > { %v349_v63 = vmul.f32 %v347_v40, %v1415_v34 }
  0xce   : > { %v296_v30 = vadd.f32 %v295_v28, %v284_v27 }
  0xd0   : > { %v307_v31 = vadd.f32 %v306_v29, %v296_v30 }
  0xd2   : > { %v308_v33 = vmul.f32 1.442695, %v307_v31  ;;  %v312_v35 = vpop.permute.xlu1 %311 }
  0xd4   : > { %987 = vset.pattern.permute.xlu2 %v1240_v36  ;;  %1007 = vpow2.f32 %v308_v33  ;;  %986 = vset.pattern.permute.xlu1 %v1241_v37  ;;  %v366_v14 = vpop.permute.xlu0 %365 }
  0xd5   : > { %531 = vperm.xlu2 %987, %v1381_v3   ;;  %526 = vperm.xlu1 %986, %v1381_v3   ;;  %v360_v56 = vpop.permute.xlu2 %359 }
  0xda   : > { %v1008_v38 = vpop.eup %1007 }
  0xdb   : > { %v314_v41 = vmul.f32 %v1008_v38, %v312_v35  ;;  %v324_v42 = vpop.permute.xlu1 %323  ;;  %v320_v43 = vmul.f32 %v1008_v38, %v318_v17  ;;  %v1252_v38 = vmov 62  }
  0xdc   : > { %v326_v44 = vmul.f32 %v324_v42, %v1430_v50 }
  0xdd   : > { %990 = vset.pattern.permute.xlu2 %v1242_v45  ;;  %v315_v46 = vadd.f32 %v314_v41, %v266_v12  ;;  %989 = vset.pattern.permute.xlu1 %v1243_v47  ;;  %v321_v49 = vadd.f32 %v320_v43, %v272_v11  ;;  %v1248_v11 = vmov 53   ;;  %v395_v27 = vpop.permute.xlu0 %394 }
  0xde   : > { %563 = vperm.xlu2 %990, %v1381_v3   ;;  %v332_v51 = vadd.f32 %v331_v39, %v326_v44  ;;  %538 = vperm.xlu1 %989, %v1381_v3   ;;  %v377_v1 = vpop.permute.xlu2 %376  ;;  %v397_v29 = vmul.f32 %v395_v27, %v1415_v34 }
  0xdf   : > { %v379_v8 = vmul.f32 %v377_v1, %v1438_v53 }
  0xe4   : > { %v340_v57 = vpop.permute.xlu1 %339 }
  0xe5   : > { %v342_v58 = vmul.f32 %v340_v57, %v1425_v48 }
  0xe6   : > { %992 = vset.pattern.permute.xlu2 %v1244_v59  ;;  %991 = vset.pattern.permute.xlu1 %v1245_v60  ;;  %v425_v57 = vpop.permute.xlu0 %424 }
  0xe7   : > { %574 = vperm.xlu2 %992, %v1381_v3   ;;  %v343_v61 = vadd.f32 %v342_v58, %v337_v55  ;;  %568 = vperm.xlu1 %991, %v1381_v3   ;;  %v388_v12 = vpop.permute.xlu2 %387 }
  0xe8   : > { %v390_v21 = vmul.f32 %v388_v12, %v1425_v48 }
  0xe9   : > { %v344_v62 = vadd.f32 %v343_v61, %v332_v51 }
  0xed   : > { %v352_v0 = vpop.permute.xlu1 %351 }
  0xee   : > { %v354_v2 = vadd.f32 %v352_v0, %v349_v63 }
  0xef   : > { %995 = vset.pattern.permute.xlu2 %v1246_v4  ;;  %994 = vset.pattern.permute.xlu1 %v1247_v5  ;;  %v1487_v60 = vpop.permute.xlu0 %455 }
  0xf0   : > { %586 = vperm.xlu2 %995, %v1381_v3   ;;  %v355_v6 = vadd.f32 %v354_v2, %v344_v62  ;;  %543 = vperm.xlu1 %994, %v1381_v3   ;;  %v408_v25 = vpop.permute.xlu2 %407 }
  0xf2   : > { %v356_v7 = vmul.f32 1.442695, %v355_v6  ;;  %v427_v6 = vmul.f32 %v425_v57, %v1438_v53 }
  0xf4   : > { %1009 = vpow2.f32 %v356_v7 }
  0xf6   : > { %v372_v9 = vpop.permute.xlu1 %371 }
  0xf7   : > { %v374_v10 = vmul.f32 %v372_v9, %v1430_v50 }
  0xf8   : > { %997 = vset.pattern.permute.xlu2 %v1248_v11  ;;  %996 = vset.pattern.permute.xlu1 %v1249_v13  ;;  %v491_v63 = vpop.permute.xlu0 %490 }
  0xf9   : > { %503 = vperm.xlu2 %997, %v1381_v3   ;;  %v380_v15 = vadd.f32 %v379_v8, %v374_v10  ;;  %591 = vperm.xlu1 %996, %v1381_v3   ;;  %v420_v35 = vpop.permute.xlu2 %419 }
  0xfa   : > { %v1010_v16 = vpop.eup %1009  ;;  %v422_v5 = vmul.f32 %v420_v35, %v1430_v50 }
  0xfb   : > { %v368_v17 = vmul.f32 %v1010_v16, %v366_v14  ;;  %v362_v18 = vmul.f32 %v1010_v16, %v360_v56  ;;  %v493_v16 = vmul.f32 %v491_v63, %v1415_v34 }
  0xfd   : > { %v369_v19 = vadd.f32 %v368_v17, %v321_v49  ;;  %v363_v20 = vadd.f32 %v362_v18, %v315_v46  ;;  %v1253_v46 = vmov 63  }
  0xff   : > { %v383_v22 = vpop.permute.xlu1 %382 }
 0x100   : > { %v385_v23 = vmul.f32 %v383_v22, %v1434_v52 }
 0x101   : > { %999 = vset.pattern.permute.xlu1 %v1250_v24  ;;  %v496_v13 = vpop.permute.xlu0 %495 }
 0x102   : > { %v391_v26 = vadd.f32 %v390_v21, %v385_v23  ;;  %599 = vperm.xlu1 %999, %v1381_v3   ;;  %v436_v40 = vpop.permute.xlu2 %435  ;;  %v498_v27 = vadd.f32 %v496_v13, %v493_v16 }
 0x103   : > { %v438_v2 = vmul.f32 %v436_v40, %v1425_v48 }
 0x104   : > { %v392_v28 = vadd.f32 %v391_v26, %v380_v15  ;;  %v428_v15 = vadd.f32 %v427_v6, %v422_v5 }
 0x108   : > { %v400_v30 = vpop.permute.xlu1 %399 }
 0x109   : > { %v402_v31 = vadd.f32 %v400_v30, %v397_v29 }
 0x10a   : > { %1000 = vset.pattern.permute.xlu1 %v1251_v32 }
 0x10b   : > { %v403_v33 = vadd.f32 %v402_v31, %v392_v28  ;;  %461 = vperm.xlu1 %1000, %v1381_v3   ;;  %v448_v47 = vpop.permute.xlu2 %447 }
 0x10d   : > { %v404_v36 = vmul.f32 1.442695, %v403_v33 }
 0x10f   : > { %1011 = vpow2.f32 %v404_v36  ;;  %v580_v36 = vpop.permute.xlu0 %579 }
 0x111   : > { %v414_v37 = vpop.permute.xlu1 %413 }
 0x113   : > { %1002 = vset.pattern.permute.xlu1 %v1252_v38 }
 0x114   : > { %557 = vperm.xlu1 %1002, %v1381_v3   ;;  %v473_v51 = vpop.permute.xlu2 %472 }
 0x115   : > { %v1012_v39 = vpop.eup %1011  ;;  %v475_v11 = vmul.f32 %v473_v51, %v1438_v53 }
 0x116   : > { %v416_v41 = vmul.f32 %v1012_v39, %v414_v37  ;;  %v410_v42 = vmul.f32 %v1012_v39, %v408_v25  ;;  %v582_v39 = vmul.f32 %v580_v36, %v1425_v48 }
 0x117   : > { %v552_v63 = vpop.permute.xlu0 %551 }
 0x118   : > { %v1482_v43 = vadd.f32 %v416_v41, %v369_v19  ;;  %v1484_v44 = vadd.f32 %v410_v42, %v363_v20 }
 0x11a   : > { %v431_v45 = vpop.permute.xlu1 %430 }
 0x11b   : > { %v433_v4 = vmul.f32 %v431_v45, %v1434_v52 }
 0x11c   : > { %1003 = vset.pattern.permute.xlu1 %v1253_v46 }
 0x11d   : > { %605 = vperm.xlu1 %1003, %v1381_v3   ;;  %v484_v55 = vpop.permute.xlu2 %483  ;;  %v439_v10 = vadd.f32 %v438_v2, %v433_v4 }
 0x11e   : > { %v486_v7 = vmul.f32 %v484_v55, %v1425_v48 }
 0x11f   : > { %v440_v22 = vadd.f32 %v439_v10, %v428_v15  ;;  %v510_v10 = vpop.permute.xlu0 %509 }
 0x123   : > { %v443_v49 = vpop.permute.xlu1 %442 }
 0x124   : > { %v445_v8 = vmul.f32 %v443_v49, %v1415_v34 }
 0x126   : > { %v521_v58 = vpop.permute.xlu2 %520  ;;  %v450_v17 = vadd.f32 %v448_v47, %v445_v8  ;;  %v221_v8 = vld [vmem:[#allocation5 + $0x10] sm:$0xff] }
 0x127   : > { %v523_v23 = vmul.f32 %v521_v58, %v1438_v53 }
 0x128   : > { %v451_v26 = vadd.f32 %v450_v17, %v440_v22  ;;  %v1254_v22 = vmov 64  }
 0x129   : > { %1004 = vset.pattern.permute.xlu0 %v1254_v22 }
 0x12a   : > { %v452_v33 = vmul.f32 1.442695, %v451_v26 }
 0x12c   : > { %v468_v54 = vpop.permute.xlu1 %467  ;;  %1013 = vpow2.f32 %v452_v33 }
 0x12d   : > { %v470_v12 = vmul.f32 %v468_v54, %v1430_v50 }
 0x12f   : > { %v532_v62 = vpop.permute.xlu2 %531  ;;  %v476_v24 = vadd.f32 %v475_v11, %v470_v12 }
 0x130   : > { %v534_v18 = vmul.f32 %v532_v62, %v1425_v48 }
 0x132   : > { %v1014_v58 = vpop.eup %1013 }
 0x135   : > { %v479_v56 = vpop.permute.xlu1 %478 }
 0x136   : > { %v481_v9 = vmul.f32 %v479_v56, %v1434_v52 }
 0x138   : > { %v564_v1 = vpop.permute.xlu2 %563  ;;  %v487_v19 = vadd.f32 %v486_v7, %v481_v9 }
 0x139   : > { %v566_v45 = vmul.f32 %v564_v1, %v1430_v50 }
 0x13a   : > { %v488_v28 = vadd.f32 %v487_v19, %v476_v24 }
 0x13c   : > { %v499_v35 = vadd.f32 %v498_v27, %v488_v28 }
 0x13e   : > { %v516_v59 = vpop.permute.xlu1 %515  ;;  %v500_v47 = vmul.f32 1.442695, %v499_v35 }
 0x13f   : > { %v518_v25 = vmul.f32 %v516_v59, %v1430_v50  ;;  %v458_v50 = vmul.f32 %v1014_v58, %v1487_v60 }
 0x140   : > { %1015 = vpow2.f32 %v500_v47 }
 0x141   : > { %v575_v21 = vpop.permute.xlu2 %574  ;;  %v524_v30 = vadd.f32 %v523_v23, %v518_v25 }
 0x142   : > { %v577_v40 = vmul.f32 %v575_v21, %v1434_v52 }
 0x144   : > { %v583_v49 = vadd.f32 %v582_v39, %v577_v40 }
 0x147   : > { %v527_v61 = vpop.permute.xlu1 %526 }
 0x148   : > { %v529_v20 = vmul.f32 %v527_v61, %v1434_v52  ;;  %v1016_v61 = vpop.eup %1015 }
 0x14a   : > { %v535_v29 = vadd.f32 %v534_v18, %v529_v20  ;;  %v587_v46 = vpop.permute.xlu2 %586 }
 0x14b   : > { %v589_v51 = vmul.f32 %v587_v46, %v1415_v34 }
 0x14c   : > { %v536_v37 = vadd.f32 %v535_v29, %v524_v30 }
 0x150   : > { %v539_v0 = vpop.permute.xlu1 %538 }
 0x151   : > { %v541_v31 = vmul.f32 %v539_v0, %v1415_v34  ;;  %v459_v34 = vadd.f32 %v458_v50, %v1484_v44 }
 0x153   : > { %v504_v59 = vpop.permute.xlu2 %503 }
 0x154   : > { %v506_v0 = vmul.f32 %v1016_v61, %v504_v59 }
 0x156   : > { %v507_v4 = vadd.f32 %v506_v0, %v459_v34 }
 0x159   : > { %v569_v14 = vpop.permute.xlu1 %568 }
 0x15a   : > { %v571_v41 = vmul.f32 %v569_v14, %v1438_v53  ;;  %v512_v14 = vmul.f32 %v1016_v61, %v510_v10 }
 0x15c   : > { %v572_v54 = vadd.f32 %v571_v41, %v566_v45 }
 0x15e   : > { %v584_v57 = vadd.f32 %v583_v49, %v572_v54 }
 0x162   : > { %v544_v32 = vpop.permute.xlu1 %543 }
 0x163   : > { %v546_v38 = vadd.f32 %v544_v32, %v541_v31 }
 0x165   : > { %v547_v42 = vadd.f32 %v546_v38, %v536_v37 }
 0x167   : > { %v548_v55 = vmul.f32 1.442695, %v547_v42 }
 0x169   : > { %1017 = vpow2.f32 %v548_v55 }
 0x16b   : > { %v592_v56 = vpop.permute.xlu1 %591 }
 0x16c   : > { %v594_v48 = vadd.f32 %v592_v56, %v589_v51 }
 0x16e   : > { %v595_v52 = vadd.f32 %v594_v48, %v584_v57 }
 0x16f   : > { %v1018_v62 = vpop.eup %1017 }
 0x170   : > { %v596_v53 = vmul.f32 1.442695, %v595_v52  ;;  %v554_v2 = vmul.f32 %v1018_v62, %v552_v63 }
 0x172   : > { %1019 = vpow2.f32 %v596_v53  ;;  %v555_v6 = vadd.f32 %v554_v2, %v507_v4 }
 0x174   : > { %v600_v1 = vpop.permute.xlu1 %599 }
 0x178   : > { %v1020_v5 = vpop.eup %1019 }
 0x179   : > { %v602_v7 = vmul.f32 %v1020_v5, %v600_v1 }
 0x17b   : > { %v603_v9 = vadd.f32 %v602_v7, %v555_v6 }
 0x17d   : > { %v462_v11 = vpop.permute.xlu1 %461  ;;  %v610_v12 = vadd.f32 %v603_v9, %v221_v8 }
 0x17e   : > { %v464_v13 = vmul.f32 %v1014_v58, %v462_v11 }
 0x17f   : > { %v612_v60 = vsel %vm611_vm0, %v610_v12, -inf }
 0x180   : > { %v465_v15 = vadd.f32 %v464_v13, %v1482_v43  ;;  %613 = vmax.xlane.f32.xlu2 %v612_v60 }
 0x182   : > { %v513_v16 = vadd.f32 %v512_v14, %v465_v15 }
 0x186   : > { %v558_v44 = vpop.permute.xlu1 %557 }
 0x187   : > { %v560_v17 = vmul.f32 %v1018_v62, %v558_v44 }
 0x189   : > { %v561_v18 = vadd.f32 %v560_v17, %v513_v16 }
 0x18f   : > { %v606_v19 = vpop.permute.xlu1 %605 }
 0x190   : > { %v608_v20 = vmul.f32 %v1020_v5, %v606_v19 }
 0x192   : > { %v609_v21 = vadd.f32 %v608_v20, %v561_v18 }
 0x1f3   : > { %v614_v23 = vpop.xlane.xlu2 %613 }
 0x1f4   : > { %v615_v24 = vrot.slane %v614_v23, 4 }
 0x1f6   : > { %v616_v25 = vmax.f32 %v614_v23, %v615_v24 }
 0x1f8   : > { %v617_v26 = vrot.slane %v616_v25, 2 }
 0x1fa   : > { %v618_v27 = vmax.f32 %v616_v25, %v617_v26 }
 0x1fc   : > { %v619_v28 = vrot.slane %v618_v27, 1 }
 0x1fe   : > { %v620_v29 = vmax.f32 %v618_v27, %v619_v28 }
 0x200   : > { %1021 = vrcp.f32 %v620_v29  ;;  %v632_v32 = vand.u32 2147483648, %v620_v29  ;;  %v630_v35 = vand.u32 2147483647, %v620_v29  ;;  %vm626_vm2 = vweird.f32 %v620_v29 }
 0x202   : > { %v633_v37 = vor.u32 1.1754944e-38, %v632_v32  ;;  %vm631_vm4 = vcmp.eq.f32.partialorder %v630_v35, 8.507059e+37 }
 0x206   : > { %v1022_v30 = vpop.eup %1021 }
 0x207   : > { %v622_v43 = vmul.f32 %v1022_v30, %v620_v29  ;;  %vm627_vm1 = vweird.f32 %v1022_v30 }
 0x208   : > { %vm628_vm3 = vmor %vm626_vm2, %vm627_vm1 }
 0x209   : > { %v623_v31 = vsub.f32 1.0, %v622_v43 }
 0x20b   : > { %v624_v33 = vmul.f32 %v1022_v30, %v623_v31 }
 0x20d   : > { %v625_v36 = vadd.f32 %v1022_v30, %v624_v33 }
 0x20f   : > { %v629_v38 = vsel %vm628_vm3, %v1022_v30, %v625_v36 }
 0x210   : > { %v634_v39 = vsel %vm631_vm4, %v633_v37, %v629_v38 }
 0x211   : > { %v635_v40 = vmul.f32 %v634_v39, %v1381_v3 }
 0x213   : > { %638 = vperm.xlu0 %1004, %v635_v40  }
 0x285   : > { %v639_v3 = vpop.permute.xlu0 %638 }
 0x286   : > { %v641_v41 = vmul.f32 %v639_v3, %v603_v9  ;;  %v644_v42 = vmul.f32 %v639_v3, %v609_v21 }
 0x288   : > { %v642_v45 = vsub.f32 1.0, %v641_v41  ;;  %645 = vst.msk [vmem:[%s215_s23] sm:$0xff] %vm611_vm0, %v644_v42 }
 0x289   : > { %1110 = shalt.err (!%p1107_p9)
}
 0x28a   : > { %818 = dma.vmem_to_hbm [thread:$0]  (%p1335_p13), %s679_s24, 128, %s681_s25, %s652_s7   ;;  %643 = vst.msk [vmem:[%s208_s27] sm:$0xff] %vm611_vm0, %v642_v45 }
 0x28b   : > { %s647_s17 = scalar_lea.sflag [#allocation4], %s1366_s5  ;;  %s1125_s18 = sshra.s32 %s1529_s19, 4  ;;  %s1126_s18 = int_to_ptr.hbm [resolvable:$true] %s1125_s18 }
 0x28c   : > { %s1127_s21 = scalar_lea.hbm %s1126_s18, 8  ;;  %s1131_s8 = scalar_lea.hbm %s1579_s2, 16 }
 0x28d   : > { %p1128_p10 = scmp.ne.s32.totalorder %s1126_s18, %s1127_s21  ;;  %p1132_p2 = scmp.lt.s32.totalorder %s1126_s18, %s1579_s2 }
 0x28e   : > { %p1133_p6 = scmp.lt.s32.totalorder %s1131_s8, %s1127_s21 }
 0x28f   : > { %p1129_p11 = pnand %p1128_p10, %p1335_p13 }
 0x290   : > { %p1134_p1 = por %p1133_p6, %p1132_p2 }
 0x291   : > { %p1130_p0 = pneg %p1129_p11 }
 0x293   : > { %p1135_p3 = pnand %p1134_p1, %p1130_p0 }
 0x295   : > { %1138 = shalt.err (!%p1135_p3)
}
 0x296   : > { %817 = dma.vmem_to_hbm [thread:$0]  (%p1335_p13), %s665_s28, 128, %s1529_s19, %s647_s17  }
 0x297 PF: > { %s692_s5 = sand.u32 1, %s1173_s12   ;;  %p1586_p5 = scmp.ge.s32.totalorder %s1185_s15, 2 }
 0x298   : > { %s693_s24 = scalar_lea.sflag [#allocation4], %s692_s5 }
 0x299   : > { %p830_p12 = pnand %p1586_p5, %p1340_p4 }
 0x29b   : > { %p831_p8 = pneg %p830_p12 }
 0x29d   : > { %1164 = dma.done.wait (%p831_p8), %s693_s24, 128  }
 0x29e   : > { %1166 = vsyncadd (%p831_p8), %s693_s24, 4294967168  ;;  %s703_s25 = scalar_lea.sflag [#allocation9], %s692_s5 }
 0x29f   : > { %1168 = dma.done.wait (%p831_p8), %s703_s25, 128  }
 0x2a0   : > { %1170 = vsyncadd (%p831_p8), %s703_s25, 4294967168  ;;  %p21_p13 = scmp.ge.s32.totalorder %s1315_s26, 4   ;;  %s1587_s12 = smov %s1177_s13 }
 0x2a1   : > { %s1588_s13 = smov %s1181_s14  ;;  %s1589_s14 = smov %s1327_s29 }
 0x2a2   : > { %s1590_s15 = smov %s1315_s26  ;;  %23 = sbr.rel (!%p21_p13) target bundleno = 8 (0x8), region = 96 }
 0x2a7   :  { %709 = vsyncpa [#allocation3], 1 }
 0x2a8   :  { %711 = vsyncpa [#allocation3 + $0x1], 1 }
 0x2a9   :  { %712 = vsyncpa [#allocation6], 1 }
 0x2aa   :  { %713 = vsyncpa [#allocation4], 1 }
 0x2ab   :  { %715 = vsyncpa [#allocation4 + $0x1], 1 }
 0x2ac   :  { %716 = vsyncpa [#allocation9], 1 }
 0x2ad   :  { %718 = vsyncpa [#allocation9 + $0x1], 1 }

</bundles_post_ra>
